<compile_context>
chip_gen: v7x
topology: tpu7x:2x2x1
jax: 0.10.0
libtpu: 0.0.40
codegen_flags: <defaults>
</compile_context>

<pallas_src>
import jax
import jax.numpy as jnp
from jax import lax
from jax.experimental import pallas as pl
from jax.experimental.pallas import tpu as pltpu

BN_EPS = 1e-5


# ----------------------------------------------------------------------------
# Fused Pallas kernel: one grid step == one GCN layer.
#   xw,res = act @ [WgT | WrT]              (merged matmul, shared LHS)
#   h      = relu(A_norm @ xw + bg)         (GCNConv + ReLU)
#   y      = h @ Wc_dense^T                 (grouped 1x1 Conv1d, block-diag)
#   y      = BN(y) (batch stats over real nodes; bc folded away)
#   act'   = y + res                        (residual Linear + add)
# A and the activation live in persistent VMEM scratch for the whole network.
# ----------------------------------------------------------------------------
def _make_gcn_kernel(n_true, n_pad, cp):
    inv_n = 1.0 / float(n_true)

    def kernel(x_hbm, a_hbm, wxT_ref, bg_ref, wcT_ref, gamma_ref, beta_ref,
               br_ref, o_ref, a_vmem, act_ref):
        layer = pl.program_id(0)

        # Layer 0: pull the grid-invariant adjacency and the network input from
        # HBM into single-buffered resident VMEM exactly once.
        @pl.when(layer == 0)
        def _():
            pltpu.sync_copy(a_hbm, a_vmem)
            pltpu.sync_copy(x_hbm, act_ref)

        act = act_ref[...]                                    # (n_pad, cp) f32
        act_bf = act.astype(jnp.bfloat16)

        # Merged matmul: GCNConv transform and residual Linear share the LHS.
        xw_res = jnp.dot(act_bf, wxT_ref[...],
                         preferred_element_type=jnp.float32)  # (n_pad, 2cp) f32
        xw = xw_res[:, :cp]
        res = xw_res[:, cp:] + br_ref[...]

        # GCNConv aggregation with the normalized adjacency, bias, ReLU.
        h = jnp.dot(a_vmem[...], xw.astype(jnp.bfloat16),
                    preferred_element_type=jnp.float32) + bg_ref[...]
        h = jnp.maximum(h, 0.0)

        # Grouped 1x1 Conv1d as a dense block-diagonal matmul (c_out <= 128).
        # TODO(synk): if profiling shows this matmul binding at small N, move it
        # to the VPU with num_heads pltpu.roll offsets instead of an MXU pass.
        y = jnp.dot(h.astype(jnp.bfloat16), wcT_ref[...],
                    preferred_element_type=jnp.float32)

        # BatchNorm1d, training-mode batch stats over the REAL node rows only
        # (padded rows are masked out of the stats and the sums are divided by
        # the true node count).  Two-pass mean / centered variance.  The conv
        # bias bc is omitted: the mean subtraction cancels it exactly.
        row_ok = lax.broadcasted_iota(jnp.int32, (n_pad, 1), 0) < n_true
        y = jnp.where(row_ok, y, 0.0)
        m = jnp.sum(y, axis=0, keepdims=True) * inv_n
        yc = jnp.where(row_ok, y - m, 0.0)
        var = jnp.sum(yc * yc, axis=0, keepdims=True) * inv_n
        # gamma/beta are ZERO-padded -> scale/shift are exactly 0 on pad lanes.
        scale = gamma_ref[...] * lax.rsqrt(var + BN_EPS)
        new_act = yc * scale + beta_ref[...] + res

        act_ref[...] = new_act     # resident activation for the next layer
        o_ref[...] = new_act       # constant out-block index; final state lands in HBM

    return kernel


# ----------------------------------------------------------------------------
# Plain-JAX glue.
# ----------------------------------------------------------------------------
def build_norm_adjacency(edge_index, num_nodes):
    """Dense PyG-GCNConv-normalized adjacency: D^-1/2 (A + I) D^-1/2."""
    src, dst = edge_index[0], edge_index[1]
    loop = jnp.arange(num_nodes, dtype=edge_index.dtype)
    src = jnp.concatenate([src, loop])
    dst = jnp.concatenate([dst, loop])
    deg = jnp.zeros((num_nodes,), jnp.float32).at[dst].add(1.0)
    dinv = jnp.where(deg > 0, 1.0 / jnp.sqrt(deg), 0.0)
    vals = dinv[src] * dinv[dst]
    # out[i] = sum over edges (j -> i) of norm * x[j]  =>  A[dst, src] += norm
    a = jnp.zeros((num_nodes, num_nodes), jnp.float32).at[dst, src].add(vals)
    return a


def expand_grouped_conv_weight(wc, num_heads):
    """wc: (C_out, num_heads) grouped 1x1-conv weight -> dense (C_out, C_out)."""
    c_out = wc.shape[0]
    groups = c_out // num_heads
    blocks = wc.reshape(groups, num_heads, num_heads)
    return jax.scipy.linalg.block_diag(*[blocks[g] for g in range(groups)])


def stack_padded_params(params, cp, w_dtype=jnp.bfloat16):
    """Zero-pad every layer's weights to lane-dense CP and stack over layers.

    Matmul weights are stored in `w_dtype` (bf16 for the MXU); biases/BN affine
    stay f32 (elementwise path).  Pad lanes of gamma/beta/bg/br MUST stay zero.
    """
    wx, bg, wc, gm, bt, br = [], [], [], [], [], []
    for p in params:
        c_in, c_out = p["wgT"].shape
        wg_pad = jnp.zeros((cp, cp), jnp.float32).at[:c_in, :c_out].set(p["wgT"])
        wr_pad = jnp.zeros((cp, cp), jnp.float32).at[:c_in, :c_out].set(p["wrT"])
        wx.append(jnp.concatenate([wg_pad, wr_pad], axis=1).astype(w_dtype))  # (cp, 2cp)
        wc.append(jnp.zeros((cp, cp), jnp.float32)
                  .at[:c_out, :c_out].set(p["wcT"]).astype(w_dtype))

        def padv(v):  # (1, c_out) -> (1, cp), zero pad
            return jnp.zeros((1, cp), jnp.float32).at[:, :c_out].set(v)

        bg.append(padv(p["bg"]))
        gm.append(padv(p["gamma"]))
        bt.append(padv(p["beta"]))
        br.append(padv(p["br"]))
    return dict(wxT=jnp.stack(wx), bg=jnp.stack(bg), wcT=jnp.stack(wc),
                gamma=jnp.stack(gm), beta=jnp.stack(bt), br=jnp.stack(br))


def _derive_vmem_limit_bytes():
    """Generation-aware VMEM budget with headroom below physical capacity."""
    mib = 1024 * 1024
    try:
        cap = int(pltpu.get_tpu_info().vmem_capacity_bytes)
    except Exception:
        cap = 64 * mib            # conservative (v7x-sized) fallback
    return int(max(32 * mib, min(cap - 12 * mib, 112 * mib)))


def gcn_forward_pallas(x, edge_index, params, *, cp=128, adj_dtype=jnp.bfloat16):
    n, c_in0 = x.shape
    num_layers = len(params)
    n_pad = ((n + 127) // 128) * 128      # lane-dense node dim; padded rows are zero

    a = build_norm_adjacency(edge_index, n)
    a_pad = jnp.zeros((n_pad, n_pad), jnp.float32).at[:n, :n].set(a).astype(adj_dtype)
    x_pad = jnp.zeros((n_pad, cp), jnp.float32).at[:n, :c_in0].set(x)
    fp = stack_padded_params(params, cp)

    kernel = _make_gcn_kernel(n, n_pad, cp)

    out_pad = pl.pallas_call(
        kernel,
        out_shape=jax.ShapeDtypeStruct((n_pad, cp), jnp.float32),
        grid=(num_layers,),
        in_specs=[
            pl.BlockSpec(memory_space=pl.ANY),                      # x (HBM, read once)
            pl.BlockSpec(memory_space=pl.ANY),                      # A (HBM, read once)
            pl.BlockSpec((None, cp, 2 * cp), lambda l: (l, 0, 0)),  # [WgT|WrT] per layer
            pl.BlockSpec((None, 1, cp), lambda l: (l, 0, 0)),       # bg
            pl.BlockSpec((None, cp, cp), lambda l: (l, 0, 0)),      # wcT (block-diag dense)
            pl.BlockSpec((None, 1, cp), lambda l: (l, 0, 0)),       # gamma
            pl.BlockSpec((None, 1, cp), lambda l: (l, 0, 0)),       # beta
            pl.BlockSpec((None, 1, cp), lambda l: (l, 0, 0)),       # br
        ],
        out_specs=pl.BlockSpec((n_pad, cp), lambda l: (0, 0)),      # resident output
        scratch_shapes=[
            pltpu.VMEM((n_pad, n_pad), adj_dtype),   # single-buffered resident A
            pltpu.VMEM((n_pad, cp), jnp.float32),    # resident activation
        ],
        compiler_params=pltpu.CompilerParams(
            dimension_semantics=("arbitrary",),          # layers are sequential
            vmem_limit_bytes=_derive_vmem_limit_bytes(),
        ),
    )(x_pad, a_pad, fp["wxT"], fp["bg"], fp["wcT"], fp["gamma"], fp["beta"], fp["br"])

    c_out_final = params[-1]["wgT"].shape[1]
    return out_pad[:n, :c_out_final]


# Pure-JAX reference with the original (unfused, unpadded, f32) semantics,
# including bc and two-pass BatchNorm.
def gcn_forward_ref(x, edge_index, params):
    a = build_norm_adjacency(edge_index, x.shape[0])
    for p in params:
        h = jnp.maximum(a @ (x @ p["wgT"]) + p["bg"], 0.0)
        y = h @ p["wcT"] + p["bc"]
        mean = y.mean(0, keepdims=True)
        var = ((y - mean) ** 2).mean(0, keepdims=True)
        y = (y - mean) / jnp.sqrt(var + BN_EPS) * p["gamma"] + p["beta"]
        x = y + x @ p["wrT"] + p["br"]
    return x


# ----------------------------------------------------------------------------
# Parameter construction (deterministic, synthetic — not a checkpoint load).
# ----------------------------------------------------------------------------
def init_params(key, hidden_dim, num_layers, num_heads):
    params = []
    for i in range(num_layers):
        c_in = hidden_dim // (2 ** i)
        c_out = hidden_dim // (2 ** (i + 1))
        key, k1, k2, k3, k4 = jax.random.split(key, 5)
        wg = jax.random.normal(k1, (c_out, c_in), jnp.float32) * (2.0 / c_in) ** 0.5
        bg = jnp.zeros((1, c_out), jnp.float32)
        wc_raw = jax.random.normal(k2, (c_out, num_heads), jnp.float32) * (1.0 / num_heads) ** 0.5
        wc = expand_grouped_conv_weight(wc_raw, num_heads)
        bc = jax.random.normal(k3, (1, c_out), jnp.float32) * 0.1
        gamma = jnp.ones((1, c_out), jnp.float32)
        beta = jnp.zeros((1, c_out), jnp.float32)
        wr = jax.random.normal(k4, (c_out, c_in), jnp.float32) * (2.0 / c_in) ** 0.5
        br = jnp.zeros((1, c_out), jnp.float32)
        params.append(dict(wgT=wg.T, bg=bg, wcT=wc.T, bc=bc,
                           gamma=gamma, beta=beta, wrT=wr.T, br=br))
    return params


if __name__ == "__main__":
    hidden_dim, num_layers, num_heads = 32, 2, 4
    num_nodes, num_edges = 64, 128

    key = jax.random.PRNGKey(0)
    kx, ke, kp = jax.random.split(key, 3)

    x = jax.random.normal(kx, (num_nodes, hidden_dim), jnp.float32)
    edge_index = jax.random.randint(ke, (2, num_edges), 0, num_nodes, dtype=jnp.int32)
    params = init_params(kp, hidden_dim, num_layers, num_heads)

    out = gcn_forward_pallas(x, edge_index, params)
    out = jax.block_until_ready(out)

    ref = gcn_forward_ref(x, edge_index, params)
    assert out.shape == (num_nodes, hidden_dim // (2 ** num_layers))
    # bf16 matmuls -> compare against the f32 reference with a scale-relative bound.
    rel_err = float(jnp.max(jnp.abs(out - ref)) / (jnp.max(jnp.abs(ref)) + 1e-6))
    assert rel_err < 5e-2, f"Pallas kernel mismatch vs JAX ref (rel_err={rel_err})"

    print("KERNEL_OK")
</pallas_src>

<mosaic_0001>
module attributes {stable_mosaic.version = 11 : i64} {
  func.func @kernel(%arg0: i32, %arg1: memref<128x128xf32, #tpu.memory_space<any>>, %arg2: memref<128x128xbf16, #tpu.memory_space<any>>, %arg3: memref<1x128x256xbf16, #tpu.memory_space<vmem>>, %arg4: memref<1x1x128xf32, #tpu.memory_space<vmem>>, %arg5: memref<1x128x128xbf16, #tpu.memory_space<vmem>>, %arg6: memref<1x1x128xf32, #tpu.memory_space<vmem>>, %arg7: memref<1x1x128xf32, #tpu.memory_space<vmem>>, %arg8: memref<1x1x128xf32, #tpu.memory_space<vmem>>, %arg9: memref<128x128xf32, #tpu.memory_space<vmem>>, %arg10: memref<128x128xbf16, #tpu.memory_space<vmem>>, %arg11: memref<128x128xf32, #tpu.memory_space<vmem>>) attributes {dimension_semantics = [#tpu.dimension_semantics<arbitrary>], iteration_bounds = array<i64: 2>, scalar_prefetch = 0 : i64, scratch_operands = 2 : i64, tpu.core_type = #tpu.core_type<tc>, window_params = [{}, {}, {transform_indices = @transform_2, window_bounds = array<i64: 1, 128, 256>}, {transform_indices = @transform_3, window_bounds = array<i64: 1, 1, 128>}, {transform_indices = @transform_4, window_bounds = array<i64: 1, 128, 128>}, {transform_indices = @transform_5, window_bounds = array<i64: 1, 1, 128>}, {transform_indices = @transform_6, window_bounds = array<i64: 1, 1, 128>}, {transform_indices = @transform_7, window_bounds = array<i64: 1, 1, 128>}, {pipeline_mode = #tpu.pipeline_mode<synchronous>, transform_indices = @transform_8, window_bounds = array<i64: 128, 128>}]} {
    %c0_i32 = arith.constant 0 : i32
    %0 = arith.cmpi eq, %arg0, %c0_i32 : i32
    %1 = arith.extui %0 : i1 to i32
    %c0_i32_0 = arith.constant 0 : i32
    %2 = arith.cmpi ne, %1, %c0_i32_0 : i32
    scf.if %2 {
      "tpu.region"() ({
        %64 = tpu.sem_alloc : memref<!tpu.dma_semaphore, #tpu.memory_space<semaphore_mem>>
        tpu.enqueue_dma source(%arg2 : memref<128x128xbf16, #tpu.memory_space<any>>) target(%arg10 : memref<128x128xbf16, #tpu.memory_space<vmem>>) target_semaphore(%64 : memref<!tpu.dma_semaphore, #tpu.memory_space<semaphore_mem>>)
        tpu.wait_dma2 semaphore(%64 : memref<!tpu.dma_semaphore, #tpu.memory_space<semaphore_mem>>) src(%arg2 : memref<128x128xbf16, #tpu.memory_space<any>>) dst(%arg10 : memref<128x128xbf16, #tpu.memory_space<vmem>>)
        tpu.yield
      }) : () -> ()
      "tpu.region"() ({
        %64 = tpu.sem_alloc : memref<!tpu.dma_semaphore, #tpu.memory_space<semaphore_mem>>
        tpu.enqueue_dma source(%arg1 : memref<128x128xf32, #tpu.memory_space<any>>) target(%arg11 : memref<128x128xf32, #tpu.memory_space<vmem>>) target_semaphore(%64 : memref<!tpu.dma_semaphore, #tpu.memory_space<semaphore_mem>>)
        tpu.wait_dma2 semaphore(%64 : memref<!tpu.dma_semaphore, #tpu.memory_space<semaphore_mem>>) src(%arg1 : memref<128x128xf32, #tpu.memory_space<any>>) dst(%arg11 : memref<128x128xf32, #tpu.memory_space<vmem>>)
        tpu.yield
      }) : () -> ()
    } else {
    }
    %c0 = arith.constant 0 : index
    %c0_1 = arith.constant 0 : index
    %3 = vector.load %arg11[%c0, %c0_1] : memref<128x128xf32, #tpu.memory_space<vmem>>, vector<128x128xf32>
    %4 = arith.truncf %3 : vector<128x128xf32> to vector<128x128xbf16>
    %c0_2 = arith.constant 0 : index
    %c0_3 = arith.constant 0 : index
    %c0_4 = arith.constant 0 : index
    %5 = vector.load %arg3[%c0_2, %c0_3, %c0_4] : memref<1x128x256xbf16, #tpu.memory_space<vmem>>, vector<1x128x256xbf16>
    %6 = vector.shape_cast %5 : vector<1x128x256xbf16> to vector<128x256xbf16>
    %cst = arith.constant dense<0.000000e+00> : vector<128x256xf32>
    %7 = tpu.matmul %4, %6, %cst {dimension_numbers = #tpu.dot_dimension_numbers<[1], [0], [0], [1], [0, 0, 1, 1], [], []>} : vector<128x128xbf16>, vector<128x256xbf16>, vector<128x256xf32> -> vector<128x256xf32>
    %8 = vector.extract_strided_slice %7 {offsets = [0, 0], sizes = [128, 128], strides = [1, 1]} : vector<128x256xf32> to vector<128x128xf32>
    %9 = vector.extract_strided_slice %7 {offsets = [0, 128], sizes = [128, 128], strides = [1, 1]} : vector<128x256xf32> to vector<128x128xf32>
    %c0_5 = arith.constant 0 : index
    %c0_6 = arith.constant 0 : index
    %c0_7 = arith.constant 0 : index
    %10 = vector.load %arg8[%c0_5, %c0_6, %c0_7] : memref<1x1x128xf32, #tpu.memory_space<vmem>>, vector<1x1x128xf32>
    %11 = vector.shape_cast %10 : vector<1x1x128xf32> to vector<1x128xf32>
    %12 = vector.broadcast %11 : vector<1x128xf32> to vector<128x128xf32>
    %13 = arith.addf %9, %12 : vector<128x128xf32>
    %c0_8 = arith.constant 0 : index
    %c0_9 = arith.constant 0 : index
    %14 = vector.load %arg10[%c0_8, %c0_9] : memref<128x128xbf16, #tpu.memory_space<vmem>>, vector<128x128xbf16>
    %15 = arith.truncf %8 : vector<128x128xf32> to vector<128x128xbf16>
    %cst_10 = arith.constant dense<0.000000e+00> : vector<128x128xf32>
    %16 = tpu.matmul %14, %15, %cst_10 {dimension_numbers = #tpu.dot_dimension_numbers<[1], [0], [0], [1], [0, 0, 1, 1], [], []>} : vector<128x128xbf16>, vector<128x128xbf16>, vector<128x128xf32> -> vector<128x128xf32>
    %c0_11 = arith.constant 0 : index
    %c0_12 = arith.constant 0 : index
    %c0_13 = arith.constant 0 : index
    %17 = vector.load %arg4[%c0_11, %c0_12, %c0_13] : memref<1x1x128xf32, #tpu.memory_space<vmem>>, vector<1x1x128xf32>
    %18 = vector.shape_cast %17 : vector<1x1x128xf32> to vector<1x128xf32>
    %19 = vector.broadcast %18 : vector<1x128xf32> to vector<128x128xf32>
    %20 = arith.addf %16, %19 : vector<128x128xf32>
    %cst_14 = arith.constant 0.000000e+00 : f32
    %21 = vector.broadcast %cst_14 : f32 to vector<128x128xf32>
    %22 = arith.maximumf %20, %21 : vector<128x128xf32>
    %23 = arith.truncf %22 : vector<128x128xf32> to vector<128x128xbf16>
    %c0_15 = arith.constant 0 : index
    %c0_16 = arith.constant 0 : index
    %c0_17 = arith.constant 0 : index
    %24 = vector.load %arg5[%c0_15, %c0_16, %c0_17] : memref<1x128x128xbf16, #tpu.memory_space<vmem>>, vector<1x128x128xbf16>
    %25 = vector.shape_cast %24 : vector<1x128x128xbf16> to vector<128x128xbf16>
    %cst_18 = arith.constant dense<0.000000e+00> : vector<128x128xf32>
    %26 = tpu.matmul %23, %25, %cst_18 {dimension_numbers = #tpu.dot_dimension_numbers<[1], [0], [0], [1], [0, 0, 1, 1], [], []>} : vector<128x128xbf16>, vector<128x128xbf16>, vector<128x128xf32> -> vector<128x128xf32>
    %27 = tpu.iota {dimensions = array<i32: 0>} : vector<128x1xi32>
    %c64_i32 = arith.constant 64 : i32
    %28 = vector.broadcast %c64_i32 : i32 to vector<128x1xi32>
    %29 = arith.cmpi slt, %27, %28 : vector<128x1xi32>
    %cst_19 = arith.constant 0.000000e+00 : f32
    %30 = vector.shape_cast %29 : vector<128x1xi1> to vector<128x1xi1>
    %31 = vector.broadcast %30 : vector<128x1xi1> to vector<128x128xi1>
    %32 = vector.broadcast %cst_19 : f32 to vector<128x128xf32>
    %33 = arith.select %31, %26, %32 : vector<128x128xi1>, vector<128x128xf32>
    %cst_20 = arith.constant dense<0.000000e+00> : vector<128xf32>
    %34 = vector.multi_reduction <add>, %33, %cst_20 [0] : vector<128x128xf32> to vector<128xf32>
    %35 = vector.shape_cast %34 : vector<128xf32> to vector<1x128xf32>
    %cst_21 = arith.constant 1.562500e-02 : f32
    %36 = vector.broadcast %cst_21 : f32 to vector<1x128xf32>
    %37 = arith.mulf %35, %36 : vector<1x128xf32>
    %38 = vector.broadcast %37 : vector<1x128xf32> to vector<128x128xf32>
    %39 = arith.subf %33, %38 : vector<128x128xf32>
    %cst_22 = arith.constant 0.000000e+00 : f32
    %40 = vector.shape_cast %29 : vector<128x1xi1> to vector<128x1xi1>
    %41 = vector.broadcast %40 : vector<128x1xi1> to vector<128x128xi1>
    %42 = vector.broadcast %cst_22 : f32 to vector<128x128xf32>
    %43 = arith.select %41, %39, %42 : vector<128x128xi1>, vector<128x128xf32>
    %44 = arith.mulf %43, %43 : vector<128x128xf32>
    %cst_23 = arith.constant dense<0.000000e+00> : vector<128xf32>
    %45 = vector.multi_reduction <add>, %44, %cst_23 [0] : vector<128x128xf32> to vector<128xf32>
    %46 = vector.shape_cast %45 : vector<128xf32> to vector<1x128xf32>
    %cst_24 = arith.constant 1.562500e-02 : f32
    %47 = vector.broadcast %cst_24 : f32 to vector<1x128xf32>
    %48 = arith.mulf %46, %47 : vector<1x128xf32>
    %c0_25 = arith.constant 0 : index
    %c0_26 = arith.constant 0 : index
    %c0_27 = arith.constant 0 : index
    %49 = vector.load %arg6[%c0_25, %c0_26, %c0_27] : memref<1x1x128xf32, #tpu.memory_space<vmem>>, vector<1x1x128xf32>
    %50 = vector.shape_cast %49 : vector<1x1x128xf32> to vector<1x128xf32>
    %cst_28 = arith.constant 9.99999974E-6 : f32
    %51 = vector.broadcast %cst_28 : f32 to vector<1x128xf32>
    %52 = arith.addf %48, %51 : vector<1x128xf32>
    %53 = math.rsqrt %52 : vector<1x128xf32>
    %54 = arith.mulf %50, %53 : vector<1x128xf32>
    %55 = vector.broadcast %54 : vector<1x128xf32> to vector<128x128xf32>
    %56 = arith.mulf %43, %55 : vector<128x128xf32>
    %c0_29 = arith.constant 0 : index
    %c0_30 = arith.constant 0 : index
    %c0_31 = arith.constant 0 : index
    %57 = vector.load %arg7[%c0_29, %c0_30, %c0_31] : memref<1x1x128xf32, #tpu.memory_space<vmem>>, vector<1x1x128xf32>
    %58 = vector.shape_cast %57 : vector<1x1x128xf32> to vector<1x128xf32>
    %59 = vector.broadcast %58 : vector<1x128xf32> to vector<128x128xf32>
    %60 = arith.addf %56, %59 : vector<128x128xf32>
    %61 = arith.addf %60, %13 : vector<128x128xf32>
    %c0_32 = arith.constant 0 : index
    %c0_33 = arith.constant 0 : index
    %62 = vector.load %arg11[%c0_32, %c0_33] : memref<128x128xf32, #tpu.memory_space<vmem>>, vector<128x128xf32>
    tpu.vector_store %arg11[%c0_32, %c0_33], %61 {strides = array<i32>} : memref<128x128xf32, #tpu.memory_space<vmem>>, vector<128x128xf32>,
    %c0_34 = arith.constant 0 : index
    %c0_35 = arith.constant 0 : index
    %63 = vector.load %arg9[%c0_34, %c0_35] : memref<128x128xf32, #tpu.memory_space<vmem>>, vector<128x128xf32>
    tpu.vector_store %arg9[%c0_34, %c0_35], %61 {strides = array<i32>} : memref<128x128xf32, #tpu.memory_space<vmem>>, vector<128x128xf32>,
    return
  }
  func.func @transform_2(%arg0: i32) -> (i32, i32, i32) {
    %c0_i32 = arith.constant 0 : i32
    %c0_i32_0 = arith.constant 0 : i32
    %c0_i32_1 = arith.constant 0 : i32
    return %arg0, %c0_i32, %c0_i32_0 : i32, i32, i32
  }
  func.func @transform_3(%arg0: i32) -> (i32, i32, i32) {
    %c0_i32 = arith.constant 0 : i32
    %c0_i32_0 = arith.constant 0 : i32
    %c0_i32_1 = arith.constant 0 : i32
    return %arg0, %c0_i32, %c0_i32_0 : i32, i32, i32
  }
  func.func @transform_4(%arg0: i32) -> (i32, i32, i32) {
    %c0_i32 = arith.constant 0 : i32
    %c0_i32_0 = arith.constant 0 : i32
    %c0_i32_1 = arith.constant 0 : i32
    return %arg0, %c0_i32, %c0_i32_0 : i32, i32, i32
  }
  func.func @transform_5(%arg0: i32) -> (i32, i32, i32) {
    %c0_i32 = arith.constant 0 : i32
    %c0_i32_0 = arith.constant 0 : i32
    %c0_i32_1 = arith.constant 0 : i32
    return %arg0, %c0_i32, %c0_i32_0 : i32, i32, i32
  }
  func.func @transform_6(%arg0: i32) -> (i32, i32, i32) {
    %c0_i32 = arith.constant 0 : i32
    %c0_i32_0 = arith.constant 0 : i32
    %c0_i32_1 = arith.constant 0 : i32
    return %arg0, %c0_i32, %c0_i32_0 : i32, i32, i32
  }
  func.func @transform_7(%arg0: i32) -> (i32, i32, i32) {
    %c0_i32 = arith.constant 0 : i32
    %c0_i32_0 = arith.constant 0 : i32
    %c0_i32_1 = arith.constant 0 : i32
    return %arg0, %c0_i32, %c0_i32_0 : i32, i32, i32
  }
  func.func @transform_8(%arg0: i32) -> (i32, i32) {
    %c0_i32 = arith.constant 0 : i32
    %c0_i32_0 = arith.constant 0 : i32
    %c0_i32_1 = arith.constant 0 : i32
    return %c0_i32, %c0_i32_0 : i32, i32
  }
}

</mosaic_0001>

<bundles_post_ra>
// kernel: tpu_custom_call.1
= control target key start
LH: loop header
LB: loop body
LE: loop exit
PB: predicated region body
PF: predicated region fallthrough
CT: control target
= control target key end

     0   :  { %13 = vsyncpa [#allocation5], 0  ;;  %s2140_s0 = inlined_call_operand.hbm [shape: f32[128,128], index: 0, kind: input, shape index: {}]   ;;  %s2141_s1 = inlined_call_operand.hbm [shape: bf16[128,128], index: 1, kind: input, shape index: {}]   ;;  %s2142_s2 = inlined_call_operand.hbm [shape: bf16[2,128,256], index: 2, kind: input, shape index: {}]   ;;  %s2143_s3 = inlined_call_operand.vmem [shape: f32[2,1,128], index: 3, kind: input, shape index: {}]   ;;  %s2144_s4 = inlined_call_operand.hbm [shape: bf16[2,128,128], index: 4, kind: input, shape index: {}]   ;;  %s2145_s5 = inlined_call_operand.vmem [shape: f32[2,1,128], index: 5, kind: input, shape index: {}]   ;;  %s2146_s6 = inlined_call_operand.vmem [shape: f32[2,1,128], index: 6, kind: input, shape index: {}]   ;;  %s2147_s7 = inlined_call_operand.vmem [shape: f32[2,1,128], index: 7, kind: input, shape index: {}]   ;;  %s2148_s8 = inlined_call_operand.hbm [shape: f32[128,128], index: 8, kind: output, shape index: {}]  }
   0x1   :  { %15 = vsyncpa [#allocation5 + $0x1], 0 }
   0x2   :  { %16 = vsyncpa [#allocation8], 0 }
   0x3   :  { %18 = vsyncpa [#allocation8 + $0x1], 0 }
   0x4   :  { %19 = vsyncpa [#allocation6], 0  ;;  %s1810_s27 = smov 0   ;;  %s1812_s28 = smov 0  }
   0x5   :  { %s1814_s29 = smov 0   ;;  %s1816_s30 = smov 0  }
   0x6 LB: > { %s1829_s9 = sadd.s32 4294967295, %s1751_s30   ;;  %s1832_s10 = sadd.s32 1, %s1751_s30   ;;  %s1751_s30 = sphi %s1816_s30, %s2160_s30   ;;  %s1747_s29 = sphi %s1814_s29, %s2159_s29   ;;  %s1743_s28 = sphi %s1812_s28, %s2158_s28   ;;  %s1739_s27 = sphi %s1810_s27, %s2157_s27  }
   0x7   : > { %s29_s11 = ssub.s32 %s1751_s30, %s1832_s10  ;;  %s32_s12 = sadd.s32 1, %s1747_s29 }
   0x8   : > { %p30_p0 = scmp.eq.s32.totalorder %s29_s11, 0  ;;  %p39_p1 = scmp.ne.s32.totalorder %s1747_s29, %s1743_s28 }
   0x9   : > { %p40_p2 = scmp.eq.s32.totalorder %s1751_s30, 0  ;;  %p45_p3 = scmp.ne.s32.totalorder %s1743_s28, %s1739_s27 }
   0xa   : > { %s1842_s13 = scalar_select %p30_p0, %s1747_s29, %s32_s12  }
   0xb   : > { %p41_p4 = por %p40_p2, %p39_p1  ;;  %p46_p5 = scmp.eq.s32.totalorder %s1829_s9, 0 }
   0xc   : > { %p1496_p6 = scmp.lt.s32.totalorder %s1751_s30, 2  ;;  %s1851_s15 = sand.u32 1, %s1747_s29  }
   0xd   : > { %p1846_p7 = por %p46_p5, %p45_p3  ;;  %s1342_s16 = sshll.u32 %s1851_s15, 7 }
   0xe   : > { %s1383_s17 = sshll.u32 %s1751_s30, 11  ;;  %s224_s21 = scalar_lea.vmem [#allocation4], %s1342_s16 }
   0xf   : > { %s2150_s14 = scalar_select %p1846_p7, 1, 0 }
  0x10   : > { %s1858_s20 = scalar_lea.hbm %s2142_s2, %s1383_s17  ;;  %s231_s22 = sshll.u32 %s224_s21, 4  ;;  %s1860_s22 = int_to_ptr.vmem [resolvable:$true] %s231_s22 }
  0x11   : > { %p1862_p8 = pnand %p1496_p6, %p41_p4  ;;  %s221_s24 = scalar_lea.sflag [#allocation5], %s1851_s15 }
  0x12   : > { %s1575_s25 = scalar_lea.hbm %s1858_s20, 2048  ;;  %s1580_s11 = scalar_lea.hbm %s2142_s2, 4096 }
  0x13   : > { %p1576_p10 = scmp.ne.s32.totalorder %s1858_s20, %s1575_s25  ;;  %p1577_p11 = pneg %p1862_p8 }
  0x14   : > { %p1581_p0 = scmp.lt.u32.totalorder %s1858_s20, %s2142_s2  ;;  %p1582_p1 = scmp.lt.u32.totalorder %s1580_s11, %s1575_s25 }
  0x15   : > { %p1578_p12 = pnand %p1577_p11, %p1576_p10  ;;  %p1584_p3 = scmp.lt.u32.totalorder %s1575_s25, %s1858_s20 }
  0x16   : > { %p1583_p2 = por %p1582_p1, %p1581_p0 }
  0x17   : > { %p1579_p13 = pneg %p1578_p12 }
  0x18   : > { %p1585_p4 = por %p1584_p3, %p1583_p2 }
  0x1a   : > { %p1586_p5 = pnand %p1585_p4, %p1579_p13 }
  0x1c   : > { %1589 = shalt.err (!%p1586_p5)
}
  0x1d   : > { %s1590_s17 = scalar_lea.vmem %s1860_s22, 2048  ;;  %s1753_s18 = smov [#allocation4]  }
  0x1e   : > { %p1591_p6 = scmp.ne.s32.totalorder %s1860_s22, %s1590_s17  ;;  %s1595_s19 = sshll.u32 %s1753_s18, 4  ;;  %s1596_s19 = int_to_ptr.vmem [resolvable:$false] %s1595_s19 }
  0x1f   : > { %s1597_s21 = scalar_lea.vmem %s1596_s19, 4096  ;;  %p1598_p9 = scmp.lt.s32.totalorder %s1860_s22, %s1596_s19 }
  0x20   : > { %p1593_p10 = pnand %p1591_p6, %p1577_p11  ;;  %p1599_p0 = scmp.lt.s32.totalorder %s1597_s21, %s1590_s17 }
  0x22   : > { %p1594_p12 = pneg %p1593_p10  ;;  %p1600_p1 = por %p1599_p0, %p1598_p9 }
  0x24   : > { %p1601_p2 = pnand %p1600_p1, %p1594_p12 }
  0x26   : > { %1604 = shalt.err (!%p1601_p2)
}
  0x27   : > { %s1754_s25 = smov 128   ;;  %s1755_s26 = smov 8  }
  0x28   : > { %1492 = dma.hbm_to_vmem [thread:$0]  (!%p1862_p8), %s1858_s20, 2048, %s1860_s22, %s221_s24, %s1754_s25, %s1754_s25, %s1755_s26  }
  0x29   : > { %p284_p13 = scmp.lt.s32.totalorder %s1751_s30, 3  ;;  %s1345_s27 = sshll.u32 %s1851_s15, 6 }
  0x2a   : > { %s1384_s11 = sshll.u32 %s1751_s30, 10  ;;  %p2152_p9 = scmp.ge.s32.totalorder %s1751_s30, 1 }
  0x2b   : > { %s1907_s18 = scalar_lea.hbm %s2144_s4, %s1384_s11  ;;  %s251_s19 = scalar_lea.vmem [#allocation7], %s1345_s27 }
  0x2c   : > { %p1900_p3 = pnand %p2152_p9, %p284_p13  ;;  %s258_s21 = sshll.u32 %s251_s19, 4  ;;  %s1909_s21 = int_to_ptr.vmem [resolvable:$true] %s258_s21 }
  0x2d   : > { %s248_s20 = scalar_lea.sflag [#allocation8], %s1851_s15  ;;  %s1605_s22 = scalar_lea.hbm %s1907_s18, 1024 }
  0x2e   : > { %p1606_p4 = scmp.ne.s32.totalorder %s1907_s18, %s1605_s22  ;;  %s1610_s25 = scalar_lea.hbm %s2144_s4, 2048 }
  0x2f   : > { %p1611_p10 = scmp.lt.u32.totalorder %s1907_s18, %s2144_s4  ;;  %p1612_p12 = scmp.lt.u32.totalorder %s1610_s25, %s1605_s22 }
  0x30   : > { %p1608_p5 = pnand %p1606_p4, %p1577_p11  ;;  %p1614_p1 = scmp.lt.u32.totalorder %s1605_s22, %s1907_s18 }
  0x31   : > { %p1613_p0 = por %p1612_p12, %p1611_p10 }
  0x32   : > { %p1609_p6 = pneg %p1608_p5 }
  0x33   : > { %p1615_p2 = por %p1614_p1, %p1613_p0 }
  0x35   : > { %p1616_p13 = pnand %p1615_p2, %p1609_p6 }
  0x37   : > { %1619 = shalt.err (!%p1616_p13)
}
  0x38   : > { %s1620_s27 = scalar_lea.vmem %s1909_s21, 1024  ;;  %s1756_s16 = smov [#allocation7]  }
  0x39   : > { %p1621_p9 = scmp.ne.s32.totalorder %s1909_s21, %s1620_s27  ;;  %s1625_s17 = sshll.u32 %s1756_s16, 4  ;;  %s1626_s17 = int_to_ptr.vmem [resolvable:$false] %s1625_s17 }
  0x3a   : > { %s1627_s19 = scalar_lea.vmem %s1626_s17, 2048  ;;  %p1628_p7 = scmp.lt.s32.totalorder %s1909_s21, %s1626_s17 }
  0x3b   : > { %p1623_p4 = pnand %p1621_p9, %p1577_p11  ;;  %p1629_p10 = scmp.lt.s32.totalorder %s1627_s19, %s1620_s27 }
  0x3d   : > { %p1624_p5 = pneg %p1623_p4  ;;  %p1630_p12 = por %p1629_p10, %p1628_p7 }
  0x3f   : > { %p1631_p0 = pnand %p1630_p12, %p1624_p5 }
  0x41   : > { %1634 = shalt.err (!%p1631_p0)
}
  0x42   : > { %s1757_s22 = smov 64   ;;  %s1758_s30 = smov 4  }
  0x43   : > { %1495 = dma.hbm_to_vmem [thread:$0]  (!%p1862_p8), %s1907_s18, 1024, %s1909_s21, %s248_s20, %s1757_s22, %s1757_s22, %s1758_s30  }
  0x44   : > { %288 = sbr.rel (%p1900_p3) target bundleno = 986 (0x3da), region = 44  ;;  %s290_s24 = sand.u32 (!%p1900_p3), 1, %s1743_s28  }
  0x45   : > { %s1349_s25 = sshll.u32 (!%p1900_p3), %s290_s24, 7  ;;  %s291_s26 = scalar_lea.sflag (!%p1900_p3), [#allocation5], %s290_s24 }
  0x46   : > { %s1940_s11 = scalar_lea.vmem (!%p1900_p3), [#allocation4], %s1349_s25  ;;  %p2154_p7 = scmp.ne.s32.totalorder (!%p1900_p3), %s2150_s14, 0 }
  0x4b   : > { %1722 = dma.done.wait (%p2154_p7), %s291_s26, 2048  }
  0x4c   : > { %1724 = vsyncadd (%p2154_p7), %s291_s26, 4294965248  ;;  %s1350_s27 = sshll.u32 %s290_s24, 6  ;;  %s300_s23 = scalar_lea.sflag [#allocation8], %s290_s24 }
  0x4d   : > { %s1946_s15 = scalar_lea.vmem [#allocation7], %s1350_s27 }
  0x4e   : > { %1726 = dma.done.wait (%p2154_p7), %s300_s23, 1024  }
  0x4f   : > { %1728 = vsyncadd (%p2154_p7), %s300_s23, 4294966272  ;;  %p344_p8 = scmp.lt.s32.totalorder %s1829_s9, 1  ;;  %p1351_p11 = scmp.ne.s32.totalorder %s1829_s9, 0 }
  0x51   : > { %s1954_s12 = scalar_select %p344_p8, %s1829_s9, 1 }
  0x52   : > { %360 = sbr.rel (%p1351_p11) target bundleno = 125 (0x7d), region = 56 }
  0x53   : > { %s349_s19 = scalar_lea.vmem %s2145_s5, %s1954_s12  ;;  %s355_s26 = scalar_lea.vmem %s2147_s7, %s1954_s12 }
  0x59   : > { %s1759_s27 = smov [#allocation2]   ;;  %s1635_s20 = scalar_lea.hbm %s2141_s1, 1024 }
  0x5a   : > { %s368_s23 = sshll.u32 %s1759_s27, 4  ;;  %p1636_p3 = scmp.ne.s32.totalorder %s2141_s1, %s1635_s20  ;;  %s369_s23 = int_to_ptr.vmem [resolvable:$true] %s368_s23 }
  0x5b   : > { %p1639_p6 = scmp.lt.u32.totalorder %s1635_s20, %s2141_s1 }
  0x5d   : > { %p1641_p1 = pnand %p1639_p6, %p1636_p3 }
  0x5f   : > { %1644 = shalt.err (!%p1641_p1)  }
  0x60   : > { %s1645_s24 = scalar_lea.vmem %s369_s23, 1024  ;;  %p1650_p13 = scmp.lt.s32.totalorder %s369_s23, %s369_s23 }
  0x61   : > { %p1646_p2 = scmp.ne.s32.totalorder %s369_s23, %s1645_s24  ;;  %p1651_p9 = scmp.lt.s32.totalorder %s1645_s24, %s1645_s24 }
  0x63   : > { %p1652_p4 = por %p1651_p9, %p1650_p13 }
  0x65   : > { %p1653_p5 = pnand %p1652_p4, %p1646_p2 }
  0x67   : > { %1656 = shalt.err (!%p1653_p5)  }
  0x68   : > { %371 = dma.hbm_to_vmem [thread:$0]  %s2141_s1, 1024, %s369_s23, [#allocation10] }
  0x69   : > { %1729 = dma.done.wait [#allocation10], 1024 }
  0x6a   : > { %1730 = vsyncadd [#allocation10], 4294966272 }
  0x6b   : > { %s1760_s18 = smov [#allocation3]   ;;  %s1657_s17 = scalar_lea.hbm %s2140_s0, 2048 }
  0x6c   : > { %s383_s21 = sshll.u32 %s1760_s18, 4  ;;  %p1658_p10 = scmp.ne.s32.totalorder %s2140_s0, %s1657_s17  ;;  %s384_s21 = int_to_ptr.vmem [resolvable:$true] %s383_s21 }
  0x6d   : > { %p1661_p12 = scmp.lt.u32.totalorder %s1657_s17, %s2140_s0 }
  0x6f   : > { %p1663_p0 = pnand %p1661_p12, %p1658_p10 }
  0x71   : > { %1666 = shalt.err (!%p1663_p0)  }
  0x72   : > { %s1667_s23 = scalar_lea.vmem %s384_s21, 2048  ;;  %p1672_p8 = scmp.lt.s32.totalorder %s384_s21, %s384_s21 }
  0x73   : > { %p1668_p7 = scmp.ne.s32.totalorder %s384_s21, %s1667_s23  ;;  %p1673_p11 = scmp.lt.s32.totalorder %s1667_s23, %s1667_s23 }
  0x75   : > { %p1674_p3 = por %p1673_p11, %p1672_p8 }
  0x77   : > { %p1675_p6 = pnand %p1674_p3, %p1668_p7 }
  0x79   : > { %1678 = shalt.err (!%p1675_p6)  }
  0x7a   : > { %386 = dma.hbm_to_vmem [thread:$0]  %s2140_s0, 2048, %s384_s21, [#allocation15] }
  0x7b   : > { %1731 = dma.done.wait [#allocation15], 2048 }
  0x7c   : > { %1732 = vsyncadd [#allocation15], 4294965248 }
  0x7d PF: > { %v1541_v0 = vld [vmem:[%s1940_s11 + $0x4] ss:$8 sps:$4 sm:$0xff]   ;;  %v1543_v1 = vld [vmem:[%s1940_s11] ss:$8 sps:$4 sm:$0xff]   ;;  %v1761_v2 = vmov 0   ;;  %v392_v20 = vld [vmem:[#allocation3 + $0x10] sm:$0xff]  ;;  %s2155_s18 = scalar_lea.vmem %s2143_s3, %s1954_s12  ;;  %s2156_s17 = scalar_lea.vmem %s2146_s6, %s1954_s12 }
  0x7e   : > { %542 = vmatprep.mubr.bf16.mxu0 %v1761_v2  ;;  %510 = vmatprep.subr.bf16.mxu0 %v1541_v0  ;;  %v1544_v3 = vld [vmem:[%s1940_s11 + $0x14] ss:$8 sps:$4 sm:$0xff]   ;;  %v1546_v4 = vld [vmem:[%s1940_s11 + $0x10] ss:$8 sps:$4 sm:$0xff]   ;;  %v1547_v5 = vld [vmem:[%s1940_s11 + $0x24] ss:$8 sps:$4 sm:$0xff]  }
  0x7f   : > { %511 = vmatpush1.bf16.msra.mxu0 %v1543_v1  ;;  %v1549_v6 = vld [vmem:[%s1940_s11 + $0x20] ss:$8 sps:$4 sm:$0xff]   ;;  %v1550_v7 = vld [vmem:[%s1940_s11 + $0x34] ss:$8 sps:$4 sm:$0xff]   ;;  %v1552_v8 = vld [vmem:[%s1940_s11 + $0x30] ss:$8 sps:$4 sm:$0xff]  }
  0x80   : > { %512 = vmatprep.subr.bf16.mxu0 %v1544_v3  ;;  %v1553_v9 = vld [vmem:[%s1940_s11 + $0x44] ss:$8 sps:$4 sm:$0xff]   ;;  %v1555_v10 = vld [vmem:[%s1940_s11 + $0x40] ss:$8 sps:$4 sm:$0xff]   ;;  %v1556_v11 = vld [vmem:[%s1940_s11 + $0x54] ss:$8 sps:$4 sm:$0xff]  }
  0x81   : > { %v1558_v12 = vld [vmem:[%s1940_s11 + $0x50] ss:$8 sps:$4 sm:$0xff]   ;;  %v1559_v13 = vld [vmem:[%s1940_s11 + $0x64] ss:$8 sps:$4 sm:$0xff]   ;;  %v1561_v14 = vld [vmem:[%s1940_s11 + $0x60] ss:$8 sps:$4 sm:$0xff]  }
  0x82   : > { %v1562_v15 = vld [vmem:[%s1940_s11 + $0x74] ss:$8 sps:$4 sm:$0xff]   ;;  %v1564_v16 = vld [vmem:[%s1940_s11 + $0x70] ss:$8 sps:$4 sm:$0xff]   ;;  %v390_v17 = vld [vmem:[#allocation3] sm:$0xff]  ;;  %s1762_s12 = smov [#allocation9]  }
  0x83   : > { %513 = vmatpush1.bf16.msra.mxu0 %v1546_v4  ;;  %v391_v18 = vld [vmem:[#allocation3 + $0x8] sm:$0xff]  ;;  %v393_v21 = vld [vmem:[#allocation3 + $0x18] sm:$0xff]  ;;  %v394_v23 = vld [vmem:[#allocation3 + $0x20] sm:$0xff]  ;;  %s1227_s22 = sshll.u32 %s1762_s12, 4  ;;  %p1497_p1 = scmp.eq.s32.totalorder %s1829_s9, 1  ;;  %s2098_s22 = int_to_ptr.vmem [resolvable:$true] %s1227_s22 }
  0x84   : > { %514 = vmatprep.subr.bf16.mxu0 %v1547_v5  ;;  %v406_v19 = vpack.c.bf16 %v391_v18, %v390_v17  ;;  %v407_v22 = vpack.c.bf16 %v393_v21, %v392_v20  ;;  %v395_v24 = vld [vmem:[#allocation3 + $0x28] sm:$0xff]  ;;  %v396_v26 = vld [vmem:[#allocation3 + $0x30] sm:$0xff]  ;;  %v397_v27 = vld [vmem:[#allocation3 + $0x38] sm:$0xff]  ;;  %s1679_s14 = scalar_lea.vmem %s2098_s22, 2048  ;;  %p1686_p4 = scmp.lt.s32.totalorder %s2098_s22, %s2098_s22 }
  0x85   : > { %v408_v25 = vpack.c.bf16 %v395_v24, %v394_v23  ;;  %v409_v28 = vpack.c.bf16 %v397_v27, %v396_v26  ;;  %v398_v29 = vld [vmem:[#allocation3 + $0x40] sm:$0xff]  ;;  %v399_v30 = vld [vmem:[#allocation3 + $0x48] sm:$0xff]  ;;  %v400_v32 = vld [vmem:[#allocation3 + $0x50] sm:$0xff]  ;;  %p1680_p2 = scmp.ne.s32.totalorder %s2098_s22, %s1679_s14  ;;  %p1687_p5 = scmp.lt.s32.totalorder %s1679_s14, %s1679_s14 }
  0x86   : > { %v410_v31 = vpack.c.bf16 %v399_v30, %v398_v29  ;;  %v401_v33 = vld [vmem:[#allocation3 + $0x58] sm:$0xff]  ;;  %v402_v35 = vld [vmem:[#allocation3 + $0x60] sm:$0xff]  ;;  %v403_v36 = vld [vmem:[#allocation3 + $0x68] sm:$0xff] }
  0x87   : > { %515 = vmatpush1.bf16.msra.mxu0 %v1549_v6  ;;  %v411_v34 = vpack.c.bf16 %v401_v33, %v400_v32  ;;  %v412_v37 = vpack.c.bf16 %v403_v36, %v402_v35  ;;  %v404_v38 = vld [vmem:[#allocation3 + $0x70] sm:$0xff]  ;;  %v405_v39 = vld [vmem:[#allocation3 + $0x78] sm:$0xff]  ;;  %v646_v41 = vld [vmem:[#allocation2] sm:$0xff]  ;;  %p1681_p13 = pnand %p1680_p2, %p1497_p1  ;;  %p1688_p10 = por %p1687_p5, %p1686_p4 }
  0x88   : > { %516 = vmatprep.subr.bf16.mxu0 %v1550_v7  ;;  %v413_v40 = vpack.c.bf16 %v405_v39, %v404_v38  ;;  %1433 = vmatprep.mubr.bf16.mxu1 %v646_v41  ;;  %v1565_v18 = vld [vmem:[%s1946_s15] sm:$0xff]   ;;  %v648_v20 = vld [vmem:[#allocation2 + $0x10] sm:$0xff]  ;;  %v1566_v21 = vld [vmem:[%s1946_s15 + $0x8] sm:$0xff]  }
  0x89   : > { %v649_v23 = vld [vmem:[#allocation2 + $0x18] sm:$0xff]  ;;  %v650_v24 = vld [vmem:[#allocation2 + $0x20] sm:$0xff]  ;;  %v651_v27 = vld [vmem:[#allocation2 + $0x28] sm:$0xff]  ;;  %p1682_p9 = pneg %p1681_p13 }
  0x8a   : > { %v1569_v26 = vld [vmem:[%s1946_s15 + $0x20] sm:$0xff]   ;;  %v1570_v29 = vld [vmem:[%s1946_s15 + $0x28] sm:$0xff]   ;;  %v653_v30 = vld [vmem:[#allocation2 + $0x38] sm:$0xff] }
  0x8b   : > { %517 = vmatpush1.bf16.msra.mxu0 %v1552_v8  ;;  %v1572_v32 = vld [vmem:[%s1946_s15 + $0x38] sm:$0xff]   ;;  %v1369_v33 = vld [vmem:[%s2155_s18] ss:$0 sm:$0xff]  ;;  %p1689_p12 = pnand %p1688_p10, %p1682_p9 }
  0x8c   : > { %518 = vmatprep.subr.bf16.mxu0 %v1553_v9 }
  0x8f   : > { %519 = vmatpush1.bf16.msra.mxu0 %v1555_v10 }
  0x90   : > { %520 = vmatprep.subr.bf16.mxu0 %v1556_v11 }
  0x93   : > { %521 = vmatpush1.bf16.msra.mxu0 %v1558_v12 }
  0x94   : > { %522 = vmatprep.subr.bf16.mxu0 %v1559_v13 }
  0x97   : > { %523 = vmatpush1.bf16.msra.mxu0 %v1561_v14 }
  0x98   : > { %524 = vmatprep.subr.bf16.mxu0 %v1562_v15 }
  0x9b   : > { %525 = vmatpush1.bf16.msra.mxu0 %v1564_v16 }
  0x9e   : > { %543 = vmatmul.mubr.bf16.vlgmr.msra.gmra.mrb[0].mxu0 %v406_v19  ;;  %v647_v19 = vld [vmem:[#allocation2 + $0x8] sm:$0xff] }
  0x9f   : > { %552 = vmatprep.mubr.bf16.mxu0 %v1761_v2 }
  0xa6   : > { %553 = vmatmul.mubr.bf16.gmra.mrb[4].mxu0 %v407_v22  ;;  %v1567_v22 = vld [vmem:[%s1946_s15 + $0x10] sm:$0xff]  }
  0xa7   : > { %562 = vmatprep.mubr.bf16.mxu0 %v1761_v2 }
  0xae   : > { %563 = vmatmul.mubr.bf16.gmra.mrb[8].mxu0 %v408_v25  ;;  %v1568_v25 = vld [vmem:[%s1946_s15 + $0x18] sm:$0xff]  }
  0xaf   : > { %572 = vmatprep.mubr.bf16.mxu0 %v1761_v2 }
  0xb6   : > { %573 = vmatmul.mubr.bf16.gmra.mrb[12].mxu0 %v409_v28  ;;  %v652_v28 = vld [vmem:[#allocation2 + $0x30] sm:$0xff] }
  0xb7   : > { %582 = vmatprep.mubr.bf16.mxu0 %v1761_v2 }
  0xbe   : > { %583 = vmatmul.mubr.bf16.gmra.mrb[16].mxu0 %v410_v31  ;;  %v1571_v31 = vld [vmem:[%s1946_s15 + $0x30] sm:$0xff]  }
  0xbf   : > { %592 = vmatprep.mubr.bf16.mxu0 %v1761_v2 }
  0xc6   : > { %593 = vmatmul.mubr.bf16.gmra.mrb[20].mxu0 %v411_v34 }
  0xc7   : > { %602 = vmatprep.mubr.bf16.mxu0 %v1761_v2 }
  0xce   : > { %603 = vmatmul.mubr.bf16.gmra.mrb[24].mxu0 %v412_v37 }
  0xcf   : > { %612 = vmatprep.mubr.bf16.mxu0 %v1761_v2 }
  0xd6   : > { %613 = vmatmul.mubr.bf16.gmra.mrb[28].mxu0 %v413_v40 }
 0x171   : > { %v544_v42 = vpop.f32.mrb[0].mxu0 }
 0x172   : > { %v2021_v43 = vpop.f32.mrb[1].mxu0 }
 0x173   : > { %v548_v44 = vpop.f32.mrb[2].mxu0 }
 0x174   : > { %v654_v45 = vpack.c.bf16 %v548_v44, %v544_v42  ;;  %v2023_v46 = vpop.f32.mrb[3].mxu0 }
 0x176   : > { %1417 = vmatprep.subr.bf16.mxu1 %v654_v45 }
 0x177   : > { %1418 = vmatpush3.bf16.msra.mxu1 %v654_v45 }
 0x179   : > { %v554_v47 = vpop.f32.mrb[4].mxu0 }
 0x17a   : > { %v2025_v48 = vpop.f32.mrb[5].mxu0 }
 0x17b   : > { %v558_v49 = vpop.f32.mrb[6].mxu0 }
 0x17c   : > { %v655_v50 = vpack.c.bf16 %v558_v49, %v554_v47  ;;  %v2027_v51 = vpop.f32.mrb[7].mxu0 }
 0x17e   : > { %1419 = vmatprep.subr.bf16.mxu1 %v655_v50 }
 0x17f   : > { %1420 = vmatpush3.bf16.msra.mxu1 %v655_v50 }
 0x181   : > { %v564_v52 = vpop.f32.mrb[8].mxu0 }
 0x182   : > { %v2029_v53 = vpop.f32.mrb[9].mxu0 }
 0x183   : > { %v568_v54 = vpop.f32.mrb[10].mxu0 }
 0x184   : > { %v656_v55 = vpack.c.bf16 %v568_v54, %v564_v52  ;;  %v2031_v56 = vpop.f32.mrb[11].mxu0 }
 0x186   : > { %1421 = vmatprep.subr.bf16.mxu1 %v656_v55 }
 0x187   : > { %1422 = vmatpush3.bf16.msra.mxu1 %v656_v55 }
 0x189   : > { %v574_v57 = vpop.f32.mrb[12].mxu0 }
 0x18a   : > { %v2033_v58 = vpop.f32.mrb[13].mxu0 }
 0x18b   : > { %v578_v59 = vpop.f32.mrb[14].mxu0 }
 0x18c   : > { %v657_v60 = vpack.c.bf16 %v578_v59, %v574_v57  ;;  %v2035_v61 = vpop.f32.mrb[15].mxu0 }
 0x18e   : > { %1423 = vmatprep.subr.bf16.mxu1 %v657_v60 }
 0x18f   : > { %1424 = vmatpush3.bf16.msra.mxu1 %v657_v60 }
 0x191   : > { %v584_v62 = vpop.f32.mrb[16].mxu0 }
 0x192   : > { %v2037_v63 = vpop.f32.mrb[17].mxu0 }
 0x193   : > { %v588_v0 = vpop.f32.mrb[18].mxu0 }
 0x194   : > { %v658_v1 = vpack.c.bf16 %v588_v0, %v584_v62  ;;  %v2039_v2 = vpop.f32.mrb[19].mxu0 }
 0x196   : > { %1425 = vmatprep.subr.bf16.mxu1 %v658_v1 }
 0x197   : > { %1426 = vmatpush3.bf16.msra.mxu1 %v658_v1 }
 0x199   : > { %v594_v3 = vpop.f32.mrb[20].mxu0 }
 0x19a   : > { %v2041_v4 = vpop.f32.mrb[21].mxu0 }
 0x19b   : > { %v598_v5 = vpop.f32.mrb[22].mxu0 }
 0x19c   : > { %v659_v6 = vpack.c.bf16 %v598_v5, %v594_v3  ;;  %v2043_v7 = vpop.f32.mrb[23].mxu0 }
 0x19e   : > { %1427 = vmatprep.subr.bf16.mxu1 %v659_v6 }
 0x19f   : > { %1428 = vmatpush3.bf16.msra.mxu1 %v659_v6 }
 0x1a1   : > { %v604_v8 = vpop.f32.mrb[24].mxu0 }
 0x1a2   : > { %v2045_v9 = vpop.f32.mrb[25].mxu0 }
 0x1a3   : > { %v608_v10 = vpop.f32.mrb[26].mxu0 }
 0x1a4   : > { %v660_v11 = vpack.c.bf16 %v608_v10, %v604_v8  ;;  %v2047_v12 = vpop.f32.mrb[27].mxu0 }
 0x1a6   : > { %1429 = vmatprep.subr.bf16.mxu1 %v660_v11 }
 0x1a7   : > { %1430 = vmatpush3.bf16.msra.mxu1 %v660_v11 }
 0x1a9   : > { %v614_v13 = vpop.f32.mrb[28].mxu0 }
 0x1aa   : > { %v2049_v14 = vpop.f32.mrb[29].mxu0 }
 0x1ab   : > { %v618_v15 = vpop.f32.mrb[30].mxu0 }
 0x1ac   : > { %v661_v16 = vpack.c.bf16 %v618_v15, %v614_v13  ;;  %v2051_v17 = vpop.f32.mrb[31].mxu0 }
 0x1ae   : > { %1431 = vmatprep.subr.bf16.mxu1 %v661_v16 }
 0x1af   : > { %1432 = vmatpush3.bf16.msra.mxu1 %v661_v16 }
 0x1b0   : > { %1449 = vmatprep.subr.bf16.mxu1 %v1565_v18 }
 0x1b2   : > { %1434 = vmatmul.mubr.bf16.vlgmr.msra.gmra.mrb[0].mxu1 %v647_v19 }
 0x1b3   : > { %1437 = vmatprep.mubr.bf16.mxu1 %v648_v20  ;;  %1450 = vmatpush3.bf16.msra.mxu1 %v1565_v18 }
 0x1b4   : > { %1451 = vmatprep.subr.bf16.mxu1 %v1566_v21 }
 0x1b7   : > { %1452 = vmatpush3.bf16.msra.mxu1 %v1566_v21 }
 0x1b8   : > { %1453 = vmatprep.subr.bf16.mxu1 %v1567_v22 }
 0x1ba   : > { %1438 = vmatmul.mubr.bf16.gmra.mrb[4].mxu1 %v649_v23 }
 0x1bb   : > { %1441 = vmatprep.mubr.bf16.mxu1 %v650_v24  ;;  %1454 = vmatpush3.bf16.msra.mxu1 %v1567_v22 }
 0x1bc   : > { %1455 = vmatprep.subr.bf16.mxu1 %v1568_v25 }
 0x1bf   : > { %1456 = vmatpush3.bf16.msra.mxu1 %v1568_v25 }
 0x1c0   : > { %1457 = vmatprep.subr.bf16.mxu1 %v1569_v26 }
 0x1c2   : > { %1442 = vmatmul.mubr.bf16.gmra.mrb[8].mxu1 %v651_v27 }
 0x1c3   : > { %1445 = vmatprep.mubr.bf16.mxu1 %v652_v28  ;;  %1458 = vmatpush3.bf16.msra.mxu1 %v1569_v26 }
 0x1c4   : > { %1459 = vmatprep.subr.bf16.mxu1 %v1570_v29 }
 0x1c7   : > { %1460 = vmatpush3.bf16.msra.mxu1 %v1570_v29 }
 0x1c8   : > { %1461 = vmatprep.subr.bf16.mxu1 %v1571_v31 }
 0x1ca   : > { %1446 = vmatmul.mubr.bf16.gmra.mrb[12].mxu1 %v653_v30 }
 0x1cb   : > { %1462 = vmatpush3.bf16.msra.mxu1 %v1571_v31 }
 0x1cc   : > { %1463 = vmatprep.subr.bf16.mxu1 %v1572_v32 }
 0x1cf   : > { %1464 = vmatpush3.bf16.msra.mxu1 %v1572_v32 }
 0x285   : > { %v1435_v34 = vpop.f32.mrb[0].mxu1 }
 0x286   : > { %v712_v35 = vadd.f32 %v1435_v34, %v1369_v33  ;;  %v703_v36 = vpop.f32.mrb[1].mxu1 }
 0x287   : > { %v704_v37 = vadd.f32 %v1369_v33, %v703_v36  ;;  %v1436_v38 = vpop.f32.mrb[2].mxu1 }
 0x288   : > { %v715_v39 = vadd.f32 %v1436_v38, %v1369_v33  ;;  %v706_v40 = vpop.f32.mrb[3].mxu1  ;;  %v768_v42 = vmax.f32 %v712_v35, 0.0 }
 0x289   : > { %v707_v41 = vadd.f32 %v1369_v33, %v706_v40  ;;  %v766_v45 = vmax.f32 %v704_v37, 0.0 }
 0x28a   : > { %v769_v44 = vmax.f32 %v715_v39, 0.0 }
 0x28b   : > { %v767_v47 = vmax.f32 %v707_v41, 0.0 }
 0x28c   : > { %v783_v49 = vpack.c.bf16 %v769_v44, %v768_v42 }
 0x28d   : > { %v782_v50 = vpack.c.bf16 %v767_v47, %v766_v45  ;;  %v1439_v52 = vpop.f32.mrb[4].mxu1 }
 0x28e   : > { %v728_v54 = vadd.f32 %v1439_v52, %v1369_v33  ;;  %v719_v55 = vpop.f32.mrb[5].mxu1 }
 0x28f   : > { %v720_v57 = vadd.f32 %v1369_v33, %v719_v55  ;;  %v1440_v59 = vpop.f32.mrb[6].mxu1  ;;  %1465 = vmatprep.mubr.bf16.mxu1 %v782_v50 }
 0x290   : > { %v731_v60 = vadd.f32 %v1440_v59, %v1369_v33  ;;  %v722_v62 = vpop.f32.mrb[7].mxu1  ;;  %1466 = vmatmul.mubr.bf16.vlgmr.msra.gmra.mrb[16].mxu1 %v783_v49  ;;  %v772_v1 = vmax.f32 %v728_v54, 0.0 }
 0x291   : > { %v723_v0 = vadd.f32 %v1369_v33, %v722_v62  ;;  %v770_v5 = vmax.f32 %v720_v57, 0.0 }
 0x292   : > { %v773_v3 = vmax.f32 %v731_v60, 0.0 }
 0x293   : > { %v771_v6 = vmax.f32 %v723_v0, 0.0 }
 0x294   : > { %v785_v8 = vpack.c.bf16 %v773_v3, %v772_v1 }
 0x295   : > { %v784_v10 = vpack.c.bf16 %v771_v6, %v770_v5  ;;  %v1443_v11 = vpop.f32.mrb[8].mxu1 }
 0x296   : > { %v744_v13 = vadd.f32 %v1443_v11, %v1369_v33  ;;  %v735_v15 = vpop.f32.mrb[9].mxu1 }
 0x297   : > { %1469 = vmatprep.mubr.bf16.mxu1 %v784_v10  ;;  %v736_v16 = vadd.f32 %v1369_v33, %v735_v15  ;;  %v1444_v18 = vpop.f32.mrb[10].mxu1 }
 0x298   : > { %1470 = vmatmul.mubr.bf16.gmra.mrb[20].mxu1 %v785_v8  ;;  %v776_v19 = vmax.f32 %v744_v13, 0.0  ;;  %v747_v20 = vadd.f32 %v1444_v18, %v1369_v33  ;;  %v738_v21 = vpop.f32.mrb[11].mxu1 }
 0x299   : > { %v774_v22 = vmax.f32 %v736_v16, 0.0  ;;  %v739_v23 = vadd.f32 %v1369_v33, %v738_v21 }
 0x29a   : > { %v777_v24 = vmax.f32 %v747_v20, 0.0 }
 0x29b   : > { %v775_v25 = vmax.f32 %v739_v23, 0.0 }
 0x29c   : > { %v787_v26 = vpack.c.bf16 %v777_v24, %v776_v19 }
 0x29d   : > { %v786_v27 = vpack.c.bf16 %v775_v25, %v774_v22  ;;  %v1447_v28 = vpop.f32.mrb[12].mxu1 }
 0x29e   : > { %v760_v29 = vadd.f32 %v1447_v28, %v1369_v33  ;;  %v751_v30 = vpop.f32.mrb[13].mxu1 }
 0x29f   : > { %v752_v31 = vadd.f32 %v1369_v33, %v751_v30  ;;  %v1448_v32 = vpop.f32.mrb[14].mxu1  ;;  %1473 = vmatprep.mubr.bf16.mxu1 %v786_v27 }
 0x2a0   : > { %v780_v34 = vmax.f32 %v760_v29, 0.0  ;;  %v763_v35 = vadd.f32 %v1448_v32, %v1369_v33  ;;  %v754_v36 = vpop.f32.mrb[15].mxu1  ;;  %1474 = vmatmul.mubr.bf16.gmra.mrb[24].mxu1 %v787_v26 }
 0x2a1   : > { %v778_v37 = vmax.f32 %v752_v31, 0.0  ;;  %v755_v38 = vadd.f32 %v1369_v33, %v754_v36 }
 0x2a2   : > { %v781_v39 = vmax.f32 %v763_v35, 0.0 }
 0x2a3   : > { %v779_v40 = vmax.f32 %v755_v38, 0.0 }
 0x2a4   : > { %v789_v41 = vpack.c.bf16 %v781_v39, %v780_v34 }
 0x2a5   : > { %v788_v42 = vpack.c.bf16 %v779_v40, %v778_v37 }
 0x2a7   : > { %1477 = vmatprep.mubr.bf16.mxu1 %v788_v42 }
 0x2a8   : > { %1478 = vmatmul.mubr.bf16.gmra.mrb[28].mxu1 %v789_v41 }
 0x363   : > { %v1467_v44 = vpop.f32.mrb[16].mxu1 }
 0x364   : > { %v888_v45 = vpop.f32.mrb[17].mxu1 }
 0x365   : > { %v1468_v47 = vpop.f32.mrb[18].mxu1 }
 0x366   : > { %v891_v49 = vpop.f32.mrb[19].mxu1 }
 0x367   : > { %v1032_v50 = vadd.f32 %v891_v49, %v888_v45 }
 0x369   : > { %v1033_v52 = vadd.f32 %v1467_v44, %v1032_v50 }
 0x36b   : > { %v1471_v54 = vpop.f32.mrb[20].mxu1  ;;  %v1034_v55 = vadd.f32 %v1468_v47, %v1033_v52 }
 0x36c   : > { %v904_v57 = vpop.f32.mrb[21].mxu1 }
 0x36d   : > { %v1035_v59 = vadd.f32 %v1034_v55, %v904_v57  ;;  %v1472_v60 = vpop.f32.mrb[22].mxu1 }
 0x36e   : > { %v907_v62 = vpop.f32.mrb[23].mxu1 }
 0x36f   : > { %v1036_v0 = vadd.f32 %v1035_v59, %v907_v62 }
 0x371   : > { %v1037_v33 = vadd.f32 %v1471_v54, %v1036_v0 }
 0x373   : > { %v1038_v1 = vadd.f32 %v1472_v60, %v1037_v33  ;;  %v1475_v3 = vpop.f32.mrb[24].mxu1  ;;  %v1129_v33 = vlaneseq }
 0x374   : > { %v920_v5 = vpop.f32.mrb[25].mxu1  ;;  %v1368_v3 = vld [vmem:[%s355_s26] ss:$0 sm:$0xff] }
 0x375   : > { %v1047_v6 = vrot.slane %v1038_v1, 4  ;;  %v1476_v8 = vpop.f32.mrb[26].mxu1  ;;  %v1124_v5 = vld [vmem:[%s349_s19] sm:$0x1] }
 0x376   : > { %v923_v10 = vpop.f32.mrb[27].mxu1 }
 0x377   : > { %v1048_v11 = vadd.f32 %v1047_v6, %v1038_v1  ;;  %v1130_v1 = vshrl.u32 %v1129_v33, 7  ;;  %v630_v10 = vadd.f32 %v1368_v3, %v2021_v43  ;;  %v639_v43 = vadd.f32 %v1368_v3, %v2039_v2 }
 0x379   : > { %v1049_v13 = vrot.slane %v1048_v11, 2  ;;  %v1131_v6 = vsub.s32 0, %v1130_v1 }
 0x37b   : > { %v1050_v15 = vadd.f32 %v1049_v13, %v1048_v11  ;;  %v1479_v16 = vpop.f32.mrb[28].mxu1  ;;  %v631_v11 = vadd.f32 %v1368_v3, %v2023_v46  ;;  %v632_v13 = vadd.f32 %v1368_v3, %v2025_v48  ;;  %v640_v46 = vadd.f32 %v1368_v3, %v2041_v4 }
 0x37c   : > { %v936_v18 = vpop.f32.mrb[29].mxu1  ;;  %v634_v16 = vadd.f32 %v1368_v3, %v2029_v53  ;;  %v641_v48 = vadd.f32 %v1368_v3, %v2043_v7  ;;  %v643_v53 = vadd.f32 %v1368_v3, %v2047_v12 }
 0x37d   : > { %v1051_v19 = vrot.slane %v1050_v15, 1  ;;  %v1480_v20 = vpop.f32.mrb[30].mxu1 }
 0x37e   : > { %v939_v21 = vpop.f32.mrb[31].mxu1  ;;  %v636_v20 = vadd.f32 %v1368_v3, %v2033_v58  ;;  %v1378_v58 = vld [vmem:[%s2156_s17] ss:$0 sm:$0xff] }
 0x37f   : > { %v1052_v22 = vadd.f32 %v1051_v19, %v1050_v15  ;;  %v633_v15 = vadd.f32 %v1368_v3, %v2027_v51  ;;  %v635_v19 = vadd.f32 %v1368_v3, %v2031_v56  ;;  %v637_v21 = vadd.f32 %v1368_v3, %v2035_v61 }
 0x380   : > { %v642_v51 = vadd.f32 %v1368_v3, %v2045_v9  ;;  %v645_v56 = vadd.f32 %v1368_v3, %v2051_v17 }
 0x381   : > { %v1053_v23 = vmul.f32 0.015625, %v1052_v22  ;;  %v638_v22 = vadd.f32 %v1368_v3, %v2037_v63 }
 0x383   : > { %v1054_v24 = vsub.f32 %v888_v45, %v1053_v23  ;;  %v1055_v25 = vsub.f32 %v891_v49, %v1053_v23  ;;  %v1056_v26 = vsub.f32 %v1467_v44, %v1053_v23  ;;  %v1057_v27 = vsub.f32 %v1468_v47, %v1053_v23 }
 0x384   : > { %v1058_v28 = vsub.f32 %v904_v57, %v1053_v23  ;;  %v1059_v29 = vsub.f32 %v907_v62, %v1053_v23  ;;  %v1060_v30 = vsub.f32 %v1471_v54, %v1053_v23  ;;  %v1061_v31 = vsub.f32 %v1472_v60, %v1053_v23 }
 0x385   : > { %v1086_v32 = vmul.f32 %v1054_v24, %v1054_v24  ;;  %v1087_v34 = vmul.f32 %v1055_v25, %v1055_v25  ;;  %v1088_v35 = vmul.f32 %v1056_v26, %v1056_v26  ;;  %v1089_v37 = vmul.f32 %v1057_v27, %v1057_v27 }
 0x386   : > { %v1090_v39 = vmul.f32 %v1058_v28, %v1058_v28  ;;  %v1091_v41 = vmul.f32 %v1059_v29, %v1059_v29  ;;  %v1092_v50 = vmul.f32 %v1060_v30, %v1060_v30  ;;  %v1093_v44 = vmul.f32 %v1061_v31, %v1061_v31 }
 0x387   : > { %v1102_v36 = vadd.f32 %v1087_v34, %v1086_v32  ;;  %v644_v32 = vadd.f32 %v1368_v3, %v2049_v14 }
 0x389   : > { %v1103_v38 = vadd.f32 %v1102_v36, %v1088_v35 }
 0x38b   : > { %v1104_v40 = vadd.f32 %v1103_v38, %v1089_v37 }
 0x38d   : > { %v1105_v42 = vadd.f32 %v1104_v40, %v1090_v39 }
 0x38f   : > { %v1106_v45 = vadd.f32 %v1105_v42, %v1091_v41 }
 0x391   : > { %v1107_v47 = vadd.f32 %v1106_v45, %v1092_v50 }
 0x393   : > { %v1108_v49 = vadd.f32 %v1107_v47, %v1093_v44 }
 0x395   : > { %v1117_v52 = vrot.slane %v1108_v49, 4 }
 0x397   : > { %v1118_v54 = vadd.f32 %v1117_v52, %v1108_v49 }
 0x399   : > { %v1119_v55 = vrot.slane %v1118_v54, 2 }
 0x39b   : > { %v1120_v57 = vadd.f32 %v1119_v55, %v1118_v54 }
 0x39d   : > { %v1121_v59 = vrot.slane %v1120_v57, 1 }
 0x39f   : > { %v1122_v60 = vadd.f32 %v1121_v59, %v1120_v57 }
 0x3a1   : > { %v1123_v62 = vmul.f32 0.015625, %v1122_v60 }
 0x3a3   : > { %v1125_v0 = vadd.f32 1e-05, %v1123_v62 }
 0x3a5   : > { %1573 = vrsqrt.f32 %v1125_v0 }
 0x3af   : > { %v1574_v8 = vpop.eup %1573 }
 0x3b0   : > { %v1127_v18 = vmul.f32 %v1574_v8, %v1124_v5 }
 0x3b2   : > { %v1132_v23 = vrot.slane %v1127_v18, %v1131_v6 }
 0x3b4   : > { %v1134_v61 = vmul.f32 %v1132_v23, %v1054_v24  ;;  %v1135_v63 = vmul.f32 %v1132_v23, %v1055_v25  ;;  %v1136_v2 = vmul.f32 %v1132_v23, %v1056_v26  ;;  %v1137_v4 = vmul.f32 %v1132_v23, %v1057_v27 }
 0x3b5   : > { %v1138_v34 = vmul.f32 %v1132_v23, %v1058_v28  ;;  %v1139_v7 = vmul.f32 %v1132_v23, %v1059_v29  ;;  %v1140_v35 = vmul.f32 %v1132_v23, %v1060_v30  ;;  %v1141_v36 = vmul.f32 %v1132_v23, %v1061_v31 }
 0x3b6   : > { %v1142_v9 = vmul.f32 0.0, %v1132_v23  ;;  %v1157_v37 = vadd.f32 %v1378_v58, %v1134_v61  ;;  %v1158_v12 = vadd.f32 %v1378_v58, %v1135_v63  ;;  %v1159_v38 = vadd.f32 %v1378_v58, %v1136_v2 }
 0x3b7   : > { %v1160_v14 = vadd.f32 %v1378_v58, %v1137_v4  ;;  %v1161_v39 = vadd.f32 %v1378_v58, %v1138_v34  ;;  %v1162_v17 = vadd.f32 %v1378_v58, %v1139_v7  ;;  %v1163_v40 = vadd.f32 %v1378_v58, %v1140_v35 }
 0x3b8   : > { %v1164_v41 = vadd.f32 %v1378_v58, %v1141_v36  ;;  %v1165_v42 = vadd.f32 %v1378_v58, %v1142_v9  ;;  %v1173_v50 = vadd.f32 %v1157_v37, %v630_v10  ;;  %v1174_v45 = vadd.f32 %v1158_v12, %v631_v11 }
 0x3b9   : > { %v1175_v24 = vadd.f32 %v1159_v38, %v632_v13  ;;  %v1176_v25 = vadd.f32 %v1160_v14, %v633_v15  ;;  %v1177_v26 = vadd.f32 %v1161_v39, %v634_v16  ;;  %v1178_v27 = vadd.f32 %v1162_v17, %v635_v19 }
 0x3ba   : > { %v1179_v28 = vadd.f32 %v1163_v40, %v636_v20  ;;  %v1180_v29 = vadd.f32 %v1164_v41, %v637_v21  ;;  %v1181_v30 = vadd.f32 %v1165_v42, %v638_v22  ;;  %v1182_v31 = vadd.f32 %v1165_v42, %v639_v43  ;;  %1189 = vst [vmem:[#allocation3] sm:$0xff] %v1173_v50 }
 0x3bb   : > { %1190 = vst [vmem:[#allocation3 + $0x8] sm:$0xff] %v1174_v45  ;;  %1205 = vst [vmem:[#allocation9] sm:$0xff] %v1173_v50  ;;  %v1183_v44 = vadd.f32 %v1165_v42, %v640_v46  ;;  %v1184_v47 = vadd.f32 %v1165_v42, %v641_v48  ;;  %v1185_v49 = vadd.f32 %v1165_v42, %v642_v51 }
 0x3bc   : > { %1206 = vst [vmem:[#allocation9 + $0x8] sm:$0xff] %v1174_v45  ;;  %v1186_v52 = vadd.f32 %v1165_v42, %v643_v53  ;;  %1191 = vst [vmem:[#allocation3 + $0x10] sm:$0xff] %v1175_v24  ;;  %v1187_v54 = vadd.f32 %v1165_v42, %v644_v32  ;;  %v1188_v55 = vadd.f32 %v1165_v42, %v645_v56 }
 0x3bd   : > { %1192 = vst [vmem:[#allocation3 + $0x18] sm:$0xff] %v1176_v25  ;;  %1193 = vst [vmem:[#allocation3 + $0x20] sm:$0xff] %v1177_v26 }
 0x3be   : > { %1194 = vst [vmem:[#allocation3 + $0x28] sm:$0xff] %v1178_v27  ;;  %1207 = vst [vmem:[#allocation9 + $0x10] sm:$0xff] %v1175_v24 }
 0x3bf   : > { %1208 = vst [vmem:[#allocation9 + $0x18] sm:$0xff] %v1176_v25  ;;  %1209 = vst [vmem:[#allocation9 + $0x20] sm:$0xff] %v1177_v26 }
 0x3c0   : > { %1210 = vst [vmem:[#allocation9 + $0x28] sm:$0xff] %v1178_v27  ;;  %1195 = vst [vmem:[#allocation3 + $0x30] sm:$0xff] %v1179_v28 }
 0x3c1   : > { %1196 = vst [vmem:[#allocation3 + $0x38] sm:$0xff] %v1180_v29  ;;  %1197 = vst [vmem:[#allocation3 + $0x40] sm:$0xff] %v1181_v30 }
 0x3c2   : > { %1198 = vst [vmem:[#allocation3 + $0x48] sm:$0xff] %v1182_v31  ;;  %1211 = vst [vmem:[#allocation9 + $0x30] sm:$0xff] %v1179_v28 }
 0x3c3   : > { %1212 = vst [vmem:[#allocation9 + $0x38] sm:$0xff] %v1180_v29  ;;  %1213 = vst [vmem:[#allocation9 + $0x40] sm:$0xff] %v1181_v30 }
 0x3c4   : > { %1214 = vst [vmem:[#allocation9 + $0x48] sm:$0xff] %v1182_v31  ;;  %1199 = vst [vmem:[#allocation3 + $0x50] sm:$0xff] %v1183_v44 }
 0x3c5   : > { %1200 = vst [vmem:[#allocation3 + $0x58] sm:$0xff] %v1184_v47  ;;  %1201 = vst [vmem:[#allocation3 + $0x60] sm:$0xff] %v1185_v49 }
 0x3c6   : > { %1202 = vst [vmem:[#allocation3 + $0x68] sm:$0xff] %v1186_v52  ;;  %1215 = vst [vmem:[#allocation9 + $0x50] sm:$0xff] %v1183_v44 }
 0x3c7   : > { %1216 = vst [vmem:[#allocation9 + $0x58] sm:$0xff] %v1184_v47  ;;  %1217 = vst [vmem:[#allocation9 + $0x60] sm:$0xff] %v1185_v49 }
 0x3c8   : > { %1218 = vst [vmem:[#allocation9 + $0x68] sm:$0xff] %v1186_v52  ;;  %1203 = vst [vmem:[#allocation3 + $0x70] sm:$0xff] %v1187_v54 }
 0x3c9   : > { %1204 = vst [vmem:[#allocation3 + $0x78] sm:$0xff] %v1188_v55  ;;  %1219 = vst [vmem:[#allocation9 + $0x70] sm:$0xff] %v1187_v54 }
 0x3ca   : > { %1220 = vst [vmem:[#allocation9 + $0x78] sm:$0xff] %v1188_v55 }
 0x3cb   : > { %1692 = shalt.err (!%p1689_p12)
}
 0x3cc   : > { %s1693_s25 = scalar_lea.hbm %s2148_s8, 2048 }
 0x3cd   : > { %p1694_p0 = scmp.ne.s32.totalorder %s2148_s8, %s1693_s25  ;;  %p1699_p11 = scmp.lt.u32.totalorder %s1693_s25, %s2148_s8 }
 0x3cf   : > { %p1695_p7 = pnand %p1694_p0, %p1497_p1 }
 0x3d1   : > { %p1696_p8 = pneg %p1695_p7 }
 0x3d3   : > { %p1701_p3 = pnand %p1699_p11, %p1696_p8 }
 0x3d5   : > { %1704 = shalt.err (!%p1701_p3)
}
 0x3d6   : > { %s1763_s15 = smov 128   ;;  %s1764_s21 = smov 8  }
 0x3d7   : > { %1486 = dma.vmem_to_hbm [thread:$0]  (%p1497_p1), %s2098_s22, 2048, %s2148_s8, [#allocation6], %s1763_s15, %s1763_s15, %s1764_s21  }
 0x3d8   : > { %1734 = dma.done.wait (%p1497_p1), [#allocation6], 2048  }
 0x3d9   : > { %1736 = vsyncadd (%p1497_p1), [#allocation6], 4294965248 }
 0x3da PF: > { %p22_p6 = scmp.ge.s32.totalorder %s1832_s10, 4   ;;  %s2157_s27 = smov %s1743_s28 }
 0x3db   : > { %s2158_s28 = smov %s1747_s29  ;;  %s2159_s29 = smov %s1842_s13 }
 0x3dc   : > { %s2160_s30 = smov %s1832_s10  ;;  %24 = sbr.rel (!%p22_p6) target bundleno = 6 (0x6), region = 120 }
 0x3e3   :  { %1243 = vsyncpa [#allocation5], 1 }
 0x3e4   :  { %1245 = vsyncpa [#allocation5 + $0x1], 1 }
 0x3e5   :  { %1246 = vsyncpa [#allocation8], 1 }
 0x3e6   :  { %1248 = vsyncpa [#allocation8 + $0x1], 1 }
 0x3e7   :  { %1249 = vsyncpa [#allocation6], 1 }
 0x3e8   :  { %1251 = vsyncpa [#allocation6 + $0x1], 1 }

</bundles_post_ra>
